<compile_context>
chip_gen: v5e
topology: v5e:2x2
jax: 0.10.0
libtpu: 0.0.40
codegen_flags: <defaults>
</compile_context>

<pallas_src>
import functools

import jax
import jax.numpy as jnp
from jax.experimental import pallas as pl
from jax.experimental.pallas import tpu as pltpu

_LN_EPS = 1e-12


def _round_up(x, m):
    return ((x + m - 1) // m) * m


def _feature_resizer_kernel(x_ref, w_ref, p_ref, o_ref, *, inv_c2):
    """One row-tile of: LayerNorm(x @ W + b) * gamma + beta.

    x_ref: (tm, C1)   input rows, native dtype (fed straight to the MXU)
    w_ref: (C1, C2p)  weight in (in x out) layout, lane-padded output dim
    p_ref: (3, C2p)   stacked [bias; gamma; beta]
    o_ref: (tm, C2p)  output tile (lane-dense, C2p multiple of 128)
    """
    # MXU matmul in native dtype with f32 accumulation (no pre-upcast).
    y = jnp.dot(x_ref[...], w_ref[...], preferred_element_type=jnp.float32)

    p = p_ref[...].astype(jnp.float32)
    y = y + p[0:1, :]                              # linear bias

    # Fused single-pass LayerNorm statistics: var = E[y^2] - E[y]^2.
    # Padded output lanes are exactly zero (zero weight cols / zero bias), so
    # full-lane sums equal the true-C2 sums; divide by the *true* C2.
    mean = jnp.sum(y, axis=-1, keepdims=True) * inv_c2
    mean_sq = jnp.sum(y * y, axis=-1, keepdims=True) * inv_c2
    var = mean_sq - mean * mean
    y = (y - mean) * jax.lax.rsqrt(var + _LN_EPS)
    y = y * p[1:2, :] + p[2:3, :]                  # LN affine (gamma, beta)

    # Dropout: identity at inference.
    # TODO(synk): training-mode stochastic dropout (pltpu.prng_*) not implemented.
    o_ref[...] = y.astype(o_ref.dtype)


def _pick_tile_and_vmem(n_rows, c1, c2p, x_bytes, out_bytes, w_bytes):
    """Pick a row tile sized against the generation's VMEM, plus a VMEM limit."""
    try:
        kind = jax.devices()[0].device_kind.lower()
    except Exception:  # pragma: no cover - be conservative if query fails
        kind = ""
    if ("v5" in kind) or ("v6" in kind):
        vmem_phys = 128 << 20          # v5e / v6e: 128 MiB VMEM per core
    else:
        vmem_phys = 64 << 20           # v7x (and unknown): 64 MiB per core
    budget = (vmem_phys * 3) // 4      # leave headroom for compiler scratch

    tm = 8
    for cand in (1024, 512, 256, 128, 64, 32, 16, 8):
        need = (2 * cand * c1 * x_bytes        # double-buffered x tile
                + 2 * cand * c2p * out_bytes   # double-buffered out tile
                + 2 * c1 * c2p * w_bytes       # weight (count 2 bufs, worst case)
                + 2 * 3 * c2p * 4)             # stacked bias/gamma/beta
        if need <= budget:
            tm = cand
            break
    # Never tile past the (8-rounded) row count.
    tm = min(tm, _round_up(max(n_rows, 1), 8))
    return tm, budget


def _invariant_spec(shape):
    """BlockSpec for a grid-invariant operand; single-buffered when supported."""
    index_map = lambda i: (0,) * len(shape)
    try:
        return pl.BlockSpec(shape, index_map, pipeline_mode=pl.Buffered(1))
    except (TypeError, AttributeError):
        # Older API without pipeline_mode / Buffered: fall back to default.
        return pl.BlockSpec(shape, index_map)


def feature_resizer(x, weight, bias, gamma, beta, *, tm=None):
    """Fused Linear -> LayerNorm(eps=1e-12) -> Dropout(identity).

    x: (B, S, C1).  weight: (C2, C1) [PyTorch nn.Linear layout].
    Returns (B, S, C2).
    """
    B, S, C1 = x.shape
    C2 = weight.shape[0]
    N = B * S
    out_dtype = x.dtype

    # Lane-pad the output feature dim to a multiple of 128 so stores are
    # unmasked / lane-dense.  Padded weight columns & params are zero.
    C2p = _round_up(C2, 128)
    pad_c2 = C2p - C2
    w_t = jnp.transpose(weight)                    # (C1, C2) in x out
    if pad_c2:
        w_t = jnp.pad(w_t, ((0, 0), (0, pad_c2)))
    params = jnp.stack([
        jnp.pad(bias, (0, pad_c2)),
        jnp.pad(gamma, (0, pad_c2)),
        jnp.pad(beta, (0, pad_c2)),
    ]).astype(jnp.float32)                         # (3, C2p)

    x_bytes = jnp.dtype(x.dtype).itemsize
    w_bytes = jnp.dtype(w_t.dtype).itemsize
    out_bytes = jnp.dtype(out_dtype).itemsize
    auto_tm, vmem_budget = _pick_tile_and_vmem(
        N, C1, C2p, x_bytes, out_bytes, w_bytes)
    if tm is None:
        tm = auto_tm

    # Pad the row count to a tile multiple (instead of asserting divisibility);
    # padded rows are computed and dropped.
    Np = _round_up(N, tm)
    x2 = x.reshape(N, C1)
    if Np != N:
        x2 = jnp.pad(x2, ((0, Np - N), (0, 0)))

    kernel = functools.partial(_feature_resizer_kernel, inv_c2=1.0 / C2)

    out = pl.pallas_call(
        kernel,
        out_shape=jax.ShapeDtypeStruct((Np, C2p), out_dtype),
        grid_spec=pltpu.PrefetchScalarGridSpec(
            num_scalar_prefetch=0,
            grid=(Np // tm,),
            in_specs=[
                pl.BlockSpec((tm, C1), lambda i: (i, 0)),   # x row tile
                _invariant_spec((C1, C2p)),                 # weight (invariant)
                _invariant_spec((3, C2p)),                  # bias/gamma/beta
            ],
            out_specs=pl.BlockSpec((tm, C2p), lambda i: (i, 0)),
        ),
        compiler_params=pltpu.CompilerParams(
            dimension_semantics=("parallel",),
            vmem_limit_bytes=vmem_budget,
        ),
    )(x2, w_t, params)

    return out[:N, :C2].reshape(B, S, C2)


def reference_feature_resizer(x, weight, bias, gamma, beta):
    y = jnp.einsum("bsc,oc->bso", x, weight) + bias
    mean = jnp.mean(y, axis=-1, keepdims=True)
    var = jnp.mean((y - mean) ** 2, axis=-1, keepdims=True)
    y = (y - mean) / jnp.sqrt(var + _LN_EPS)
    return y * gamma + beta


if __name__ == "__main__":
    # Small shapes consistent with the module: embeddings of dim C1 -> dim C2.
    B, S = 2, 8
    C1, C2 = 32, 32

    key = jax.random.PRNGKey(0)
    kx, kw, kb = jax.random.split(key, 3)

    x = jax.random.normal(kx, (B, S, C1), dtype=jnp.float32)

    # Deterministic parameter init (nn.Linear-like uniform; LN gamma=1, beta=0).
    bound = 1.0 / (C1 ** 0.5)
    weight = jax.random.uniform(kw, (C2, C1), minval=-bound, maxval=bound,
                                dtype=jnp.float32)
    bias = jax.random.uniform(kb, (C2,), minval=-bound, maxval=bound,
                              dtype=jnp.float32)
    gamma = jnp.ones((C2,), dtype=jnp.float32)
    beta = jnp.zeros((C2,), dtype=jnp.float32)

    out = feature_resizer(x, weight, bias, gamma, beta)
    out = jax.block_until_ready(out)

    ref = reference_feature_resizer(x, weight, bias, gamma, beta)
    assert out.shape == (B, S, C2)
    assert jnp.allclose(out, ref, atol=1e-5, rtol=1e-5), "mismatch vs reference"

    print("KERNEL_OK")
</pallas_src>

<mosaic_0001>
module attributes {stable_mosaic.version = 11 : i64} {
  func.func @_feature_resizer_kernel(%arg0: i32, %arg1: memref<16x32xf32, #tpu.memory_space<vmem>>, %arg2: memref<32x128xf32, #tpu.memory_space<vmem>>, %arg3: memref<3x128xf32, #tpu.memory_space<vmem>>, %arg4: memref<16x128xf32, #tpu.memory_space<vmem>>) attributes {dimension_semantics = [#tpu.dimension_semantics<parallel>], iteration_bounds = array<i64: 1>, scalar_prefetch = 0 : i64, scratch_operands = 0 : i64, tpu.core_type = #tpu.core_type<tc>, window_params = [{transform_indices = @transform_0, window_bounds = array<i64: 16, 32>}, {pipeline_mode = #tpu.pipeline_mode<synchronous>, transform_indices = @transform_1, window_bounds = array<i64: 32, 128>}, {pipeline_mode = #tpu.pipeline_mode<synchronous>, transform_indices = @transform_2, window_bounds = array<i64: 3, 128>}, {transform_indices = @transform_3, window_bounds = array<i64: 16, 128>}]} {
    %c0 = arith.constant 0 : index
    %c0_0 = arith.constant 0 : index
    %0 = vector.load %arg1[%c0, %c0_0] : memref<16x32xf32, #tpu.memory_space<vmem>>, vector<16x32xf32>
    %c0_1 = arith.constant 0 : index
    %c0_2 = arith.constant 0 : index
    %1 = vector.load %arg2[%c0_1, %c0_2] : memref<32x128xf32, #tpu.memory_space<vmem>>, vector<32x128xf32>
    %cst = arith.constant dense<0.000000e+00> : vector<16x128xf32>
    %2 = tpu.matmul %0, %1, %cst {dimension_numbers = #tpu.dot_dimension_numbers<[1], [0], [0], [1], [0, 0, 1, 1], [], []>} : vector<16x32xf32>, vector<32x128xf32>, vector<16x128xf32> -> vector<16x128xf32>
    %c0_3 = arith.constant 0 : index
    %c0_4 = arith.constant 0 : index
    %3 = vector.load %arg3[%c0_3, %c0_4] : memref<3x128xf32, #tpu.memory_space<vmem>>, vector<3x128xf32>
    %4 = vector.extract_strided_slice %3 {offsets = [0, 0], sizes = [1, 128], strides = [1, 1]} : vector<3x128xf32> to vector<1x128xf32>
    %5 = vector.broadcast %4 : vector<1x128xf32> to vector<16x128xf32>
    %6 = arith.addf %2, %5 : vector<16x128xf32>
    %cst_5 = arith.constant dense<0.000000e+00> : vector<16xf32>
    %7 = vector.multi_reduction <add>, %6, %cst_5 [1] : vector<16x128xf32> to vector<16xf32>
    %8 = vector.shape_cast %7 : vector<16xf32> to vector<16x1xf32>
    %cst_6 = arith.constant 3.125000e-02 : f32
    %9 = vector.broadcast %cst_6 : f32 to vector<16x1xf32>
    %10 = arith.mulf %8, %9 : vector<16x1xf32>
    %11 = arith.mulf %6, %6 : vector<16x128xf32>
    %cst_7 = arith.constant dense<0.000000e+00> : vector<16xf32>
    %12 = vector.multi_reduction <add>, %11, %cst_7 [1] : vector<16x128xf32> to vector<16xf32>
    %13 = vector.shape_cast %12 : vector<16xf32> to vector<16x1xf32>
    %cst_8 = arith.constant 3.125000e-02 : f32
    %14 = vector.broadcast %cst_8 : f32 to vector<16x1xf32>
    %15 = arith.mulf %13, %14 : vector<16x1xf32>
    %16 = arith.mulf %10, %10 : vector<16x1xf32>
    %17 = arith.subf %15, %16 : vector<16x1xf32>
    %18 = vector.broadcast %10 : vector<16x1xf32> to vector<16x128xf32>
    %19 = arith.subf %6, %18 : vector<16x128xf32>
    %cst_9 = arith.constant 9.99999996E-13 : f32
    %20 = vector.broadcast %cst_9 : f32 to vector<16x1xf32>
    %21 = arith.addf %17, %20 : vector<16x1xf32>
    %22 = math.rsqrt %21 : vector<16x1xf32>
    %23 = vector.broadcast %22 : vector<16x1xf32> to vector<16x128xf32>
    %24 = arith.mulf %19, %23 : vector<16x128xf32>
    %25 = vector.extract_strided_slice %3 {offsets = [1, 0], sizes = [1, 128], strides = [1, 1]} : vector<3x128xf32> to vector<1x128xf32>
    %26 = vector.broadcast %25 : vector<1x128xf32> to vector<16x128xf32>
    %27 = arith.mulf %24, %26 : vector<16x128xf32>
    %28 = vector.extract_strided_slice %3 {offsets = [2, 0], sizes = [1, 128], strides = [1, 1]} : vector<3x128xf32> to vector<1x128xf32>
    %29 = vector.broadcast %28 : vector<1x128xf32> to vector<16x128xf32>
    %30 = arith.addf %27, %29 : vector<16x128xf32>
    %c0_10 = arith.constant 0 : index
    %c0_11 = arith.constant 0 : index
    %31 = vector.load %arg4[%c0_10, %c0_11] : memref<16x128xf32, #tpu.memory_space<vmem>>, vector<16x128xf32>
    tpu.vector_store %arg4[%c0_10, %c0_11], %30 {strides = array<i32>} : memref<16x128xf32, #tpu.memory_space<vmem>>, vector<16x128xf32>,
    return
  }
  func.func @transform_0(%arg0: i32) -> (i32, i32) {
    %c0_i32 = arith.constant 0 : i32
    %c0_i32_0 = arith.constant 0 : i32
    return %arg0, %c0_i32 : i32, i32
  }
  func.func @transform_1(%arg0: i32) -> (i32, i32) {
    %c0_i32 = arith.constant 0 : i32
    %c0_i32_0 = arith.constant 0 : i32
    %c0_i32_1 = arith.constant 0 : i32
    return %c0_i32, %c0_i32_0 : i32, i32
  }
  func.func @transform_2(%arg0: i32) -> (i32, i32) {
    %c0_i32 = arith.constant 0 : i32
    %c0_i32_0 = arith.constant 0 : i32
    %c0_i32_1 = arith.constant 0 : i32
    return %c0_i32, %c0_i32_0 : i32, i32
  }
  func.func @transform_3(%arg0: i32) -> (i32, i32) {
    %c0_i32 = arith.constant 0 : i32
    %c0_i32_0 = arith.constant 0 : i32
    return %arg0, %c0_i32 : i32, i32
  }
}

</mosaic_0001>

<bundles_post_ra>
// kernel: tpu_custom_call.1
= control target key start
LH: loop header
LB: loop body
LE: loop exit
PB: predicated region body
PF: predicated region fallthrough
CT: control target
= control target key end

     0   :  { %8 = vsyncpa [#allocation3], 0  ;;  %s335_s0 = inlined_call_operand.hbm [shape: f32[16,32], index: 0, kind: input, shape index: {}]   ;;  %s336_s1 = inlined_call_operand.hbm [shape: f32[32,128], index: 1, kind: input, shape index: {}]   ;;  %s337_s2 = inlined_call_operand.hbm [shape: f32[3,128], index: 2, kind: input, shape index: {}]   ;;  %s338_s3 = inlined_call_operand.hbm [shape: f32[16,128], index: 3, kind: output, shape index: {}]  }
   0x1   :  { %9 = vsyncpa [#allocation6], 0 }
   0x2   :  { %10 = vsyncpa [#allocation4], 0  ;;  %s28_s14 = sshll.u32 %s336_s1, 4  ;;  %s288_s15 = smov [#allocation5]   ;;  %s29_s14 = int_to_ptr.hbm [resolvable:$true] %s28_s14 }
   0x3   :  { %s30_s16 = sshll.u32 %s288_s15, 4  ;;  %s15_s19 = sshll.u32 %s335_s0, 4  ;;  %s31_s16 = int_to_ptr.vmem [resolvable:$true] %s30_s16  ;;  %s16_s19 = int_to_ptr.hbm [resolvable:$true] %s15_s19 }
   0x4   :  { %s289_s20 = smov 128   ;;  %s290_s21 = smov 8  }
   0x5   :  { %36 = dma.hbm_to_vmem [thread:$0]  %s29_s14, 512, %s31_s16, [#allocation6], %s289_s20, %s289_s20, %s290_s21  }
   0x6   :  { %s291_s22 = smov [#allocation2]   ;;  %s42_s1 = sshll.u32 %s337_s2, 4  ;;  %s43_s1 = int_to_ptr.hbm [resolvable:$true] %s42_s1 }
   0x7   :  { %s17_s23 = sshll.u32 %s291_s22, 4  ;;  %s292_s0 = smov [#allocation7]   ;;  %s18_s23 = int_to_ptr.vmem [resolvable:$true] %s17_s23 }
   0x8   :  { %23 = dma.hbm_to_vmem [thread:$0]  %s16_s19, 256, %s18_s23, [#allocation3], %s289_s20, %s289_s20, %s290_s21  }
   0x9   :  { %s44_s26 = sshll.u32 %s292_s0, 4  ;;  %s45_s26 = int_to_ptr.vmem [resolvable:$true] %s44_s26 }
   0xa   :  { %47 = dma.hbm_to_vmem [thread:$0]  %s43_s1, 64, %s45_s26, [#allocation6]  }
   0xb   :  { %282 = dma.done.wait [#allocation3], 256  }
   0xc   :  { %283 = vsyncadd [#allocation3], 4294967040 }
   0xd   :  { %284 = dma.done.wait [#allocation6], 576  }
   0xe   :  { %285 = vsyncadd [#allocation6], 4294966720  ;;  %v65_v0 = vld [vmem:[#allocation5 + $0x18] sm:$0xff]  ;;  %v64_v1 = vld [vmem:[#allocation5 + $0x10] sm:$0xff]  ;;  %vm68_vm0 = vcmask 261120   ;;  %s293_s2 = smov [#allocation8]  }
   0xf   :  { %87 = vmatpush.msra.mxu0 %v65_v0  ;;  %172 = vmatpush.msra.mxu1 %v65_v0  ;;  %v63_v2 = vld [vmem:[#allocation5 + $0x8] sm:$0xff]  ;;  %v62_v3 = vld [vmem:[#allocation5] sm:$0xff]  ;;  %v60_v4 = vld [vmem:[#allocation2] sm:$0xff]  ;;  %s154_s27 = sshll.u32 %s293_s2, 4  ;;  %s156_s30 = sshll.u32 %s338_s3, 4  ;;  %s155_s27 = int_to_ptr.vmem [resolvable:$true] %s154_s27  ;;  %s157_s30 = int_to_ptr.hbm [resolvable:$true] %s156_s30 }
  0x10   :  { %v61_v5 = vld [vmem:[#allocation2 + $0x8] sm:$0xff]  ;;  %v66_v6 = vld [vmem:[#allocation7] sm:$0x7] }
  0x11   :  { %88 = vmatpush.msra.mxu0 %v64_v1  ;;  %173 = vmatpush.msra.mxu1 %v64_v1  ;;  %v67_v7 = vperm.slane %v66_v6, 0  ;;  %v142_v36 = vperm.slane %v66_v6, 1  ;;  %v145_v40 = vperm.slane %v66_v6, 2 }
  0x13   :  { %89 = vmatpush.msra.mxu0 %v63_v2  ;;  %174 = vmatpush.msra.mxu1 %v63_v2 }
  0x15   :  { %90 = vmatpush.msra.mxu0 %v62_v3  ;;  %175 = vmatpush.msra.mxu1 %v62_v3 }
  0x16   :  { %170 = vmatmul.msk.f32.vlgmr.msra.gmra.mxu0 %vm68_vm0, %v60_v4  ;;  %171 = vmatmul.msk.f32.vlgmr.msra.gmra.mxu1 %vm68_vm0, %v61_v5 }
  0x93   :  { %v92_v8 = vpop.f32.mrf.mxu0  ;;  %v95_v10 = vpop.f32.mrf.mxu1 }
  0x94   :  { %v93_v9 = vadd.f32 %v92_v8, %v67_v7  ;;  %v96_v12 = vadd.f32 %v95_v10, %v67_v7 }
  0x96   :  { %98 = vadd.xlane.f32.xlu0 %v93_v9  ;;  %v104_v11 = vmul.f32 %v93_v9, %v93_v9  ;;  %v105_v13 = vmul.f32 %v96_v12, %v96_v12 }
  0x98   :  { %106 = vadd.xlane.f32.xlu1 %v104_v11 }
  0x9e   :  { %100 = vadd.xlane.f32.xlu0 %v96_v12 }
  0xa0   :  { %108 = vadd.xlane.f32.xlu1 %v105_v13 }
 0x109   :  { %v99_v14 = vpop.xlane.xlu0 %98 }
 0x10a   :  { %v102_v15 = vmul.f32 0.03125, %v99_v14 }
 0x10b   :  { %v107_v16 = vpop.xlane.xlu1 %106 }
 0x10c   :  { %v112_v17 = vmul.f32 %v102_v15, %v102_v15  ;;  %v110_v18 = vmul.f32 0.03125, %v107_v16  ;;  %v116_v37 = vsub.f32 %v93_v9, %v102_v15 }
 0x10e   :  { %v114_v19 = vsub.f32 %v110_v18, %v112_v17 }
 0x110   :  { %v118_v20 = vadd.f32 1e-12, %v114_v19 }
 0x111   :  { %v101_v21 = vpop.xlane.xlu0 %100 }
 0x112   :  { %182 = vrsqrt.f32 %v118_v20  ;;  %v103_v22 = vmul.f32 0.03125, %v101_v21  ;;  %vm126_vm2 = vweird.f32 %v118_v20 }
 0x113   :  { %v109_v23 = vpop.xlane.xlu1 %108 }
 0x114   :  { %v113_v24 = vmul.f32 %v103_v22, %v103_v22  ;;  %v111_v25 = vmul.f32 0.03125, %v109_v23  ;;  %v117_v47 = vsub.f32 %v96_v12, %v103_v22 }
 0x116   :  { %v115_v26 = vsub.f32 %v111_v25, %v113_v24 }
 0x118   :  { %v183_v27 = vpop.eup %182  ;;  %v119_v28 = vadd.f32 1e-12, %v115_v26 }
 0x119   :  { %v121_v29 = vmul.f32 %v183_v27, %v118_v20  ;;  %vm127_vm1 = vweird.f32 %v183_v27 }
 0x11a   :  { %184 = vrsqrt.f32 %v119_v28  ;;  %vm128_vm3 = vmor %vm126_vm2, %vm127_vm1  ;;  %vm136_vm5 = vweird.f32 %v119_v28 }
 0x11b   :  { %v122_v30 = vmul.f32 %v183_v27, %v121_v29 }
 0x11d   :  { %v123_v31 = vmul.f32 0.5, %v122_v30 }
 0x11f   :  { %v124_v32 = vsub.f32 1.5, %v123_v31 }
 0x120   :  { %v185_v33 = vpop.eup %184 }
 0x121   :  { %v125_v34 = vmul.f32 %v183_v27, %v124_v32  ;;  %v131_v35 = vmul.f32 %v185_v33, %v119_v28  ;;  %vm137_vm4 = vweird.f32 %v185_v33 }
 0x122   :  { %vm138_vm6 = vmor %vm136_vm5, %vm137_vm4 }
 0x123   :  { %v129_v38 = vsel %vm128_vm3, %v183_v27, %v125_v34  ;;  %v132_v39 = vmul.f32 %v185_v33, %v131_v35 }
 0x124   :  { %v140_v41 = vmul.f32 %v129_v38, %v116_v37 }
 0x125   :  { %v133_v42 = vmul.f32 0.5, %v132_v39 }
 0x126   :  { %v143_v43 = vmul.f32 %v142_v36, %v140_v41 }
 0x127   :  { %v134_v44 = vsub.f32 1.5, %v133_v42 }
 0x128   :  { %v146_v45 = vadd.f32 %v145_v40, %v143_v43 }
 0x129   :  { %v135_v46 = vmul.f32 %v185_v33, %v134_v44 }
 0x12a   :  { %148 = vst [vmem:[#allocation8] sm:$0xff] %v146_v45 }
 0x12b   :  { %v139_v48 = vsel %vm138_vm6, %v185_v33, %v135_v46 }
 0x12c   :  { %v141_v49 = vmul.f32 %v139_v48, %v117_v47 }
 0x12e   :  { %v144_v50 = vmul.f32 %v142_v36, %v141_v49 }
 0x130   :  { %v147_v51 = vadd.f32 %v145_v40, %v144_v50 }
 0x132   :  { %149 = vst [vmem:[#allocation8 + $0x8] sm:$0xff] %v147_v51 }
 0x133   :  { %162 = dma.vmem_to_hbm [thread:$0]  %s155_s27, 256, %s157_s30, [#allocation4], %s289_s20, %s289_s20, %s290_s21  }
 0x134   :  { %286 = dma.done.wait [#allocation4], 256  }
 0x135   :  { %287 = vsyncadd [#allocation4], 4294967040 }
 0x136   :  { %167 = vsyncpa [#allocation3], 1 }
 0x137   :  { %168 = vsyncpa [#allocation6], 1 }
 0x138   :  { %169 = vsyncpa [#allocation4], 1 }

</bundles_post_ra>
